<compile_context>
chip_gen: v7x
topology: tpu7x:2x2x1
jax: 0.10.0
libtpu: 0.0.40
codegen_flags: <defaults>
</compile_context>

<pallas_src>
import functools
import math

import jax
import jax.numpy as jnp
from jax.experimental import pallas as pl
from jax.experimental.pallas import tpu as pltpu


def _cdiv(a, b):
    return (a + b - 1) // b


def _round_up(a, b):
    return _cdiv(a, b) * b


def _segmerge_kernel(n_out, x_ref, rhs_ref, s_ref, csb_ref, bb_ref, o_ref):
    """Fused LayerNorm + Linear on `pack` lane-packed logical rows per kernel row.

    x_ref:   (tm, K)       input dtype (f32/bf16); K = pack*d_in
    rhs_ref: (K, 2*n_out)  bf16  [ blockdiag(W') | blockdiag(1/d_in) ]
    s_ref:   (K, n_out)    bf16  blockdiag(1/d_in)  (second-moment reduce)
    csb_ref: (1, n_out)    f32   tiled colsum(W')
    bb_ref:  (1, n_out)    f32   tiled (beta @ W + b)
    o_ref:   (tm, n_out)   output dtype
    """
    x_bf = x_ref[...].astype(jnp.bfloat16)
    xsq_bf = x_bf * x_bf                           # bf16 square on the VPU

    # One MXU pass (N = 2*n_out) yields projection AND segmented mean.
    am = jnp.dot(x_bf, rhs_ref[...], preferred_element_type=jnp.float32)
    a = am[:, :n_out]                              # x @ W'  (per packed segment)
    mu = am[:, n_out:]                             # E[x], broadcast over segment lanes
    # Segmented second moment via the same block-diagonal reduce.
    msq = jnp.dot(xsq_bf, s_ref[...], preferred_element_type=jnp.float32)

    var = jnp.maximum(msq - mu * mu, 0.0)          # one-pass stats can dip < 0
    r = jax.lax.rsqrt(var + 1e-5)
    out = r * a - (r * mu) * csb_ref[...] + bb_ref[...]
    o_ref[...] = out.astype(o_ref.dtype)


def _choose_pack(d_out):
    """Smallest pack with pack*d_out a multiple of 128 lanes (dense stores)."""
    if d_out >= 128:
        return 1
    pack = 128 // math.gcd(128, d_out)
    if pack > 8:                       # pathological d_out: settle for >= 128 lanes
        pack = _cdiv(128, d_out)
    return pack


def _choose_tile(rows, k_lanes, n_out, in_isz, out_isz):
    """Packed rows per grid step (multiple of 8, <= rows, large as VMEM allows)."""
    if rows < 8:
        return rows
    budget = 16 * 1024 * 1024          # double-buffered streaming in+out tiles
    per_row = 2 * (k_lanes * in_isz + n_out * out_isz)
    tm = min(2048, max(8, (budget // per_row) // 8 * 8))
    if rows > tm:
        # Keep >= ~8 grid steps for megacore / v7x 2-TC load balance, but never
        # shrink below 512 packed rows per step (per-step overhead ~0.35 us).
        tm = min(tm, max(512, _round_up(_cdiv(rows, 8), 8)))
    return max(8, min(tm, (rows // 8) * 8))


def seg_merging_pallas(x2d, gamma, beta, w, b, out_dtype=None):
    """x2d: (M, d_in).  gamma/beta: (1, d_in).  w: (d_in, d_out).  b: (1, d_out)."""
    M, d_in = x2d.shape
    d_out = w.shape[1]
    out_dtype = x2d.dtype if out_dtype is None else out_dtype

    # --- fold the LayerNorm affine into the Linear (done once under jit) ---
    #   out = r*(x @ W') - (r*mean)*colsum(W') + (beta @ W + b),  W' = diag(gamma) W
    w_fold = gamma.reshape(d_in, 1) * w
    b_fold = beta.reshape(1, d_in) @ w + b.reshape(1, d_out)
    col_sum = jnp.sum(w_fold, axis=0, keepdims=True)

    # --- lane packing: `pack` logical rows side-by-side -> 128-multiple lanes ---
    pack = _choose_pack(d_out)
    k_lanes = pack * d_in
    n_out = pack * d_out
    eye = jnp.eye(pack, dtype=w.dtype)
    w_big = jnp.kron(eye, w_fold)                                  # (K, n_out)
    s_big = jnp.kron(eye, jnp.full((d_in, d_out), 1.0 / d_in, w.dtype))
    rhs = jnp.concatenate([w_big, s_big], axis=1).astype(jnp.bfloat16)  # (K, 2*n_out)
    s_bf = s_big.astype(jnp.bfloat16)
    cs_b = jnp.tile(col_sum, (1, pack)).astype(jnp.float32)
    b_b = jnp.tile(b_fold, (1, pack)).astype(jnp.float32)

    # --- packed-row view. Pad (copy) ONLY when M % pack != 0; ragged last grid
    # tiles are handled by Pallas masking, so no full-array pad to the tile. ---
    m_pad = _round_up(M, pack)
    if m_pad != M:
        x2d = jnp.pad(x2d, ((0, m_pad - M), (0, 0)))
    rows = m_pad // pack
    xp = x2d.reshape(rows, k_lanes)                                # free reshape

    in_isz = x2d.dtype.itemsize
    out_isz = jnp.dtype(out_dtype).itemsize
    tm = _choose_tile(rows, k_lanes, n_out, in_isz, out_isz)
    grid = (_cdiv(rows, tm),)

    ws_bytes = (2 * tm * (k_lanes * in_isz + n_out * out_isz)
                + 2 * (k_lanes * 3 * n_out * 2) + 4 * n_out * 4)
    vmem_limit = int(min(64 * 2**20, max(32 * 2**20, 2 * ws_bytes)))

    cost = pl.CostEstimate(
        flops=int(6 * rows * k_lanes * n_out),
        transcendentals=int(rows * n_out),
        bytes_accessed=int(rows * k_lanes * in_isz + rows * n_out * out_isz
                           + k_lanes * 3 * n_out * 2 + 2 * n_out * 4),
    )

    kernel = functools.partial(_segmerge_kernel, n_out)

    out_p = pl.pallas_call(
        kernel,
        out_shape=jax.ShapeDtypeStruct((rows, n_out), out_dtype),
        grid_spec=pltpu.PrefetchScalarGridSpec(
            num_scalar_prefetch=0,
            grid=grid,
            in_specs=[
                pl.BlockSpec((tm, k_lanes), lambda i: (i, 0)),
                pl.BlockSpec((k_lanes, 2 * n_out), lambda i: (0, 0)),
                pl.BlockSpec((k_lanes, n_out), lambda i: (0, 0)),
                pl.BlockSpec((1, n_out), lambda i: (0, 0)),
                pl.BlockSpec((1, n_out), lambda i: (0, 0)),
            ],
            out_specs=pl.BlockSpec((tm, n_out), lambda i: (i, 0)),
        ),
        compiler_params=pltpu.CompilerParams(
            dimension_semantics=("parallel",),
            vmem_limit_bytes=vmem_limit,
        ),
        cost_estimate=cost,
    )(xp, rhs, s_bf, cs_b, b_b)

    # (rows, pack*d_out) -> (m_pad, d_out) is the same row-major memory.
    return out_p.reshape(m_pad, d_out)[:M]


@functools.partial(jax.jit, static_argnames=("win_size",))
def scale_block6_forward(x, params, *, win_size):
    """x: (B, ts_d, seg_num, d_model).  Reproduces scale_block6.forward with
    depth=0 (no encode layers): x -> SegMerging(x) -> (out, None)."""
    B, ts_d, seg_num, d_model = x.shape

    if win_size > 1:
        # SegMerging glue: pad tail segments + interleave (== contiguous reshape).
        pad_num = seg_num % win_size
        if pad_num != 0:
            pad_num = win_size - pad_num
            x = jnp.concatenate([x, x[:, :, -pad_num:, :]], axis=-2)
        new_seg = x.shape[2] // win_size
        d_in = win_size * d_model
        x2d = x.reshape(B * ts_d * new_seg, d_in)

        out2d = seg_merging_pallas(
            x2d,
            params["ln_gamma"], params["ln_beta"],
            params["lin_w"], params["lin_b"],
        )
        x = out2d.reshape(B, ts_d, new_seg, d_model)

    # TODO(synk): depth == 0 — TwoStageAttentionLayer5 not defined in reference.
    return x, None


def _reference_forward(x, params, *, win_size):
    """Pure-JAX f32 reference of the same computation (for correctness check)."""
    B, ts_d, seg_num, d_model = x.shape
    pad_num = seg_num % win_size
    if pad_num != 0:
        pad_num = win_size - pad_num
        x = jnp.concatenate([x, x[:, :, -pad_num:, :]], axis=-2)
    new_seg = x.shape[2] // win_size
    d_in = win_size * d_model
    y = x.reshape(B, ts_d, new_seg, d_in)
    mean = jnp.mean(y, axis=-1, keepdims=True)
    var = jnp.mean((y - mean) ** 2, axis=-1, keepdims=True)
    yhat = (y - mean) / jnp.sqrt(var + 1e-5)
    yhat = yhat * params["ln_gamma"][0] + params["ln_beta"][0]
    out = yhat @ params["lin_w"] + params["lin_b"][0]
    return out


if __name__ == "__main__":
    # Small shapes consistent with the module's forward:
    #   x: (batch, ts_dim, seg_num, d_model) = (2, 4, 9, 32), win_size = 2
    #   -> padded seg 10 -> merged seg 5, features 64 -> projected back to 32.
    B, TS_D, SEG, D_MODEL = 2, 4, 9, 32
    WIN = 2
    D_IN = WIN * D_MODEL

    key = jax.random.PRNGKey(0)
    kx, kg, kb, kw, kbias = jax.random.split(key, 5)

    x = jax.random.normal(kx, (B, TS_D, SEG, D_MODEL), dtype=jnp.float32)

    # Deterministic parameter init (synthetic, not a checkpoint load).
    params = {
        # LayerNorm(win_size * d_model) affine params
        "ln_gamma": (1.0 + 0.1 * jax.random.normal(kg, (1, D_IN), jnp.float32)),
        "ln_beta": 0.1 * jax.random.normal(kb, (1, D_IN), jnp.float32),
        # Linear(win_size * d_model -> d_model); stored as (D_in, D_out) = W^T
        "lin_w": (jax.random.normal(kw, (D_IN, D_MODEL), jnp.float32)
                  / jnp.sqrt(D_IN)),
        "lin_b": 0.1 * jax.random.normal(kbias, (1, D_MODEL), jnp.float32),
    }

    out, attn = scale_block6_forward(x, params, win_size=WIN)
    out = jax.block_until_ready(out)

    ref = _reference_forward(x, params, win_size=WIN)
    expected_seg = (SEG + (WIN - SEG % WIN) % WIN) // WIN
    assert out.shape == (B, TS_D, expected_seg, D_MODEL)
    assert attn is None
    # bf16 MXU operands -> loosened tolerance vs. the f32 reference.
    assert jnp.allclose(out, ref, atol=5e-2, rtol=5e-2), "mismatch vs reference"

    print("KERNEL_OK")
</pallas_src>

<mosaic_0001>
module attributes {stable_mosaic.version = 11 : i64} {
  func.func @_segmerge_kernel(%arg0: i32, %arg1: memref<8x256xf32, #tpu.memory_space<vmem>>, %arg2: memref<256x256xbf16, #tpu.memory_space<vmem>>, %arg3: memref<256x128xbf16, #tpu.memory_space<vmem>>, %arg4: memref<1x128xf32, #tpu.memory_space<vmem>>, %arg5: memref<1x128xf32, #tpu.memory_space<vmem>>, %arg6: memref<8x128xf32, #tpu.memory_space<vmem>>) attributes {dimension_semantics = [#tpu.dimension_semantics<parallel>], iteration_bounds = array<i64: 2>, scalar_prefetch = 0 : i64, scratch_operands = 0 : i64, tpu.core_type = #tpu.core_type<tc>, window_params = [{transform_indices = @transform_0, window_bounds = array<i64: 8, 256>}, {pipeline_mode = #tpu.pipeline_mode<synchronous>, transform_indices = @transform_1, window_bounds = array<i64: 256, 256>}, {pipeline_mode = #tpu.pipeline_mode<synchronous>, transform_indices = @transform_2, window_bounds = array<i64: 256, 128>}, {pipeline_mode = #tpu.pipeline_mode<synchronous>, transform_indices = @transform_3, window_bounds = array<i64: 1, 128>}, {pipeline_mode = #tpu.pipeline_mode<synchronous>, transform_indices = @transform_4, window_bounds = array<i64: 1, 128>}, {transform_indices = @transform_5, window_bounds = array<i64: 8, 128>}]} {
    %c0 = arith.constant 0 : index
    %c0_0 = arith.constant 0 : index
    %0 = vector.load %arg1[%c0, %c0_0] : memref<8x256xf32, #tpu.memory_space<vmem>>, vector<8x256xf32>
    %1 = arith.truncf %0 : vector<8x256xf32> to vector<8x256xbf16>
    %2 = arith.mulf %1, %1 : vector<8x256xbf16>
    %c0_1 = arith.constant 0 : index
    %c0_2 = arith.constant 0 : index
    %3 = vector.load %arg2[%c0_1, %c0_2] : memref<256x256xbf16, #tpu.memory_space<vmem>>, vector<256x256xbf16>
    %cst = arith.constant dense<0.000000e+00> : vector<8x256xf32>
    %4 = tpu.matmul %1, %3, %cst {dimension_numbers = #tpu.dot_dimension_numbers<[1], [0], [0], [1], [0, 0, 1, 1], [], []>} : vector<8x256xbf16>, vector<256x256xbf16>, vector<8x256xf32> -> vector<8x256xf32>
    %5 = vector.extract_strided_slice %4 {offsets = [0, 0], sizes = [8, 128], strides = [1, 1]} : vector<8x256xf32> to vector<8x128xf32>
    %6 = vector.extract_strided_slice %4 {offsets = [0, 128], sizes = [8, 128], strides = [1, 1]} : vector<8x256xf32> to vector<8x128xf32>
    %c0_3 = arith.constant 0 : index
    %c0_4 = arith.constant 0 : index
    %7 = vector.load %arg3[%c0_3, %c0_4] : memref<256x128xbf16, #tpu.memory_space<vmem>>, vector<256x128xbf16>
    %cst_5 = arith.constant dense<0.000000e+00> : vector<8x128xf32>
    %8 = tpu.matmul %2, %7, %cst_5 {dimension_numbers = #tpu.dot_dimension_numbers<[1], [0], [0], [1], [0, 0, 1, 1], [], []>} : vector<8x256xbf16>, vector<256x128xbf16>, vector<8x128xf32> -> vector<8x128xf32>
    %9 = arith.mulf %6, %6 : vector<8x128xf32>
    %10 = arith.subf %8, %9 : vector<8x128xf32>
    %cst_6 = arith.constant 0.000000e+00 : f32
    %11 = vector.broadcast %cst_6 : f32 to vector<8x128xf32>
    %12 = arith.maximumf %10, %11 : vector<8x128xf32>
    %cst_7 = arith.constant 9.99999974E-6 : f32
    %13 = vector.broadcast %cst_7 : f32 to vector<8x128xf32>
    %14 = arith.addf %12, %13 : vector<8x128xf32>
    %15 = math.rsqrt %14 : vector<8x128xf32>
    %16 = arith.mulf %15, %5 : vector<8x128xf32>
    %17 = arith.mulf %15, %6 : vector<8x128xf32>
    %c0_8 = arith.constant 0 : index
    %c0_9 = arith.constant 0 : index
    %18 = vector.load %arg4[%c0_8, %c0_9] : memref<1x128xf32, #tpu.memory_space<vmem>>, vector<1x128xf32>
    %19 = vector.broadcast %18 : vector<1x128xf32> to vector<8x128xf32>
    %20 = arith.mulf %17, %19 : vector<8x128xf32>
    %21 = arith.subf %16, %20 : vector<8x128xf32>
    %c0_10 = arith.constant 0 : index
    %c0_11 = arith.constant 0 : index
    %22 = vector.load %arg5[%c0_10, %c0_11] : memref<1x128xf32, #tpu.memory_space<vmem>>, vector<1x128xf32>
    %23 = vector.broadcast %22 : vector<1x128xf32> to vector<8x128xf32>
    %24 = arith.addf %21, %23 : vector<8x128xf32>
    %c0_12 = arith.constant 0 : index
    %c0_13 = arith.constant 0 : index
    %25 = vector.load %arg6[%c0_12, %c0_13] : memref<8x128xf32, #tpu.memory_space<vmem>>, vector<8x128xf32>
    tpu.vector_store %arg6[%c0_12, %c0_13], %24 {strides = array<i32>} : memref<8x128xf32, #tpu.memory_space<vmem>>, vector<8x128xf32>,
    return
  }
  func.func @transform_0(%arg0: i32) -> (i32, i32) {
    %c0_i32 = arith.constant 0 : i32
    %c0_i32_0 = arith.constant 0 : i32
    return %arg0, %c0_i32 : i32, i32
  }
  func.func @transform_1(%arg0: i32) -> (i32, i32) {
    %c0_i32 = arith.constant 0 : i32
    %c0_i32_0 = arith.constant 0 : i32
    %c0_i32_1 = arith.constant 0 : i32
    return %c0_i32, %c0_i32_0 : i32, i32
  }
  func.func @transform_2(%arg0: i32) -> (i32, i32) {
    %c0_i32 = arith.constant 0 : i32
    %c0_i32_0 = arith.constant 0 : i32
    %c0_i32_1 = arith.constant 0 : i32
    return %c0_i32, %c0_i32_0 : i32, i32
  }
  func.func @transform_3(%arg0: i32) -> (i32, i32) {
    %c0_i32 = arith.constant 0 : i32
    %c0_i32_0 = arith.constant 0 : i32
    %c0_i32_1 = arith.constant 0 : i32
    return %c0_i32, %c0_i32_0 : i32, i32
  }
  func.func @transform_4(%arg0: i32) -> (i32, i32) {
    %c0_i32 = arith.constant 0 : i32
    %c0_i32_0 = arith.constant 0 : i32
    %c0_i32_1 = arith.constant 0 : i32
    return %c0_i32, %c0_i32_0 : i32, i32
  }
  func.func @transform_5(%arg0: i32) -> (i32, i32) {
    %c0_i32 = arith.constant 0 : i32
    %c0_i32_0 = arith.constant 0 : i32
    return %arg0, %c0_i32 : i32, i32
  }
}

</mosaic_0001>

<bundles_post_ra>
// kernel: scale_block6_forward.1
= control target key start
LH: loop header
LB: loop body
LE: loop exit
PB: predicated region body
PF: predicated region fallthrough
CT: control target
= control target key end

     0   :  { %s904_s18 = smov 0   ;;  %s1079_s0 = inlined_call_operand.vmem [shape: f32[10,256], index: 0, kind: input, shape index: {}]   ;;  %s1080_s1 = inlined_call_operand.vmem [shape: bf16[256,256], index: 1, kind: input, shape index: {}]   ;;  %s1081_s2 = inlined_call_operand.vmem [shape: bf16[256,128], index: 2, kind: input, shape index: {}]   ;;  %s1082_s3 = inlined_call_operand.vmem [shape: f32[1,128], index: 3, kind: input, shape index: {}]   ;;  %s1083_s4 = inlined_call_operand.vmem [shape: f32[1,128], index: 4, kind: input, shape index: {}]   ;;  %s1084_s5 = inlined_call_operand.vmem [shape: f32[10,128], index: 5, kind: output, shape index: {}]  }
   0x1 LB: > { %s709_s19 = sadd.s32 4294967295, %s872_s18   ;;  %p713_p0 = scmp.ge.s32.totalorder %s872_s18, 1  ;;  %s872_s18 = sphi %s904_s18, %s15_s18  }
   0x2   : > { %p187_p1 = scmp.lt.s32.totalorder %s872_s18, 3 }
   0x4   : > { %p188_p2 = pnand %p713_p0, %p187_p1 }
   0x5   : > { %v800_v0 = vld [vmem:[%s1080_s1 + $0x4] ss:$8 sps:$4 sm:$0xff] (!%p188_p2)   ;;  %v802_v1 = vld [vmem:[%s1080_s1] ss:$8 sps:$4 sm:$0xff] (!%p188_p2)   ;;  %v803_v2 = vld [vmem:[%s1080_s1 + $0x14] ss:$8 sps:$4 sm:$0xff] (!%p188_p2)  }
   0x6   : > { %191 = sbr.rel (%p188_p2) target bundleno = 311 (0x137), region = 40  ;;  %422 = vmatprep.subr.bf16.mxu0 (!%p188_p2), %v800_v0  ;;  %v805_v3 = vld [vmem:[%s1080_s1 + $0x10] ss:$8 sps:$4 sm:$0xff] (!%p188_p2)   ;;  %v806_v4 = vld [vmem:[%s1080_s1 + $0x24] ss:$8 sps:$4 sm:$0xff] (!%p188_p2)   ;;  %p214_p3 = scmp.lt.s32.totalorder (!%p188_p2), %s709_s19, 1 }
   0x7   : > { %423 = vmatpush1.bf16.msra.mxu0 (!%p188_p2), %v802_v1  ;;  %v808_v5 = vld [vmem:[%s1080_s1 + $0x20] ss:$8 sps:$4 sm:$0xff] (!%p188_p2)   ;;  %v809_v6 = vld [vmem:[%s1080_s1 + $0x34] ss:$8 sps:$4 sm:$0xff] (!%p188_p2)   ;;  %v811_v7 = vld [vmem:[%s1080_s1 + $0x30] ss:$8 sps:$4 sm:$0xff] (!%p188_p2)  }
   0x8   : > { %424 = vmatprep.subr.bf16.mxu0 (!%p188_p2), %v803_v2  ;;  %v812_v8 = vld [vmem:[%s1080_s1 + $0x44] ss:$8 sps:$4 sm:$0xff] (!%p188_p2)   ;;  %v814_v11 = vld [vmem:[%s1080_s1 + $0x40] ss:$8 sps:$4 sm:$0xff] (!%p188_p2)   ;;  %v815_v14 = vld [vmem:[%s1080_s1 + $0x54] ss:$8 sps:$4 sm:$0xff] (!%p188_p2)  }
   0x9   : > { %v824_v9 = vld [vmem:[%s1081_s2 + $0x40] sm:$0xff] (!%p188_p2)   ;;  %v829_v12 = vld [vmem:[%s1081_s2 + $0x48] sm:$0xff] (!%p188_p2)   ;;  %v817_v15 = vld [vmem:[%s1080_s1 + $0x50] ss:$8 sps:$4 sm:$0xff] (!%p188_p2)  }
   0xa   : > { %v825_v10 = vld [vmem:[%s1081_s2] sm:$0xff] (!%p188_p2)   ;;  %770 = vmatprep.subr.bf16.mxu1 (!%p188_p2), %v824_v9  ;;  %v830_v13 = vld [vmem:[%s1081_s2 + $0x8] sm:$0xff] (!%p188_p2)   ;;  %v834_v16 = vld [vmem:[%s1081_s2 + $0x50] sm:$0xff] (!%p188_p2)  }
   0xb   : > { %425 = vmatpush1.bf16.msra.mxu0 (!%p188_p2), %v805_v3  ;;  %771 = vmatpush3.bf16.msra.mxu1 (!%p188_p2), %v825_v10  ;;  %v835_v17 = vld [vmem:[%s1081_s2 + $0x10] sm:$0xff] (!%p188_p2)   ;;  %v818_v18 = vld [vmem:[%s1080_s1 + $0x64] ss:$8 sps:$4 sm:$0xff] (!%p188_p2)   ;;  %v839_v19 = vld [vmem:[%s1081_s2 + $0x58] sm:$0xff] (!%p188_p2)  }
   0xc   : > { %426 = vmatprep.subr.bf16.mxu0 (!%p188_p2), %v806_v4  ;;  %772 = vmatprep.subr.bf16.mxu1 (!%p188_p2), %v829_v12  ;;  %v840_v20 = vld [vmem:[%s1081_s2 + $0x18] sm:$0xff] (!%p188_p2)   ;;  %v820_v21 = vld [vmem:[%s1080_s1 + $0x60] ss:$8 sps:$4 sm:$0xff] (!%p188_p2)   ;;  %v826_v26 = vld [vmem:[%s1080_s1 + $0x84] ss:$8 sps:$4 sm:$0xff] (!%p188_p2)  }
   0xd   : > { %v821_v22 = vld [vmem:[%s1080_s1 + $0x74] ss:$8 sps:$4 sm:$0xff]   ;;  %v844_v23 = vld [vmem:[%s1081_s2 + $0x60] sm:$0xff]   ;;  %v823_v24 = vld [vmem:[%s1080_s1 + $0x70] ss:$8 sps:$4 sm:$0xff]   ;;  %s1086_s19 = smov (!%p214_p3, %s709_s19), 1 }
   0xe   : > { %v845_v25 = vld [vmem:[%s1081_s2 + $0x20] sm:$0xff]   ;;  %v849_v27 = vld [vmem:[%s1081_s2 + $0x68] sm:$0xff]   ;;  %v854_v30 = vld [vmem:[%s1081_s2 + $0x70] sm:$0xff]   ;;  %s769_s11 = sshll.u32 %s1086_s19, 4  ;;  %s716_s30 = sshll.u32 %s1086_s19, 3 }
   0xf   : > { %427 = vmatpush1.bf16.msra.mxu0 %v808_v5  ;;  %773 = vmatpush3.bf16.msra.mxu1 %v830_v13  ;;  %v828_v28 = vld [vmem:[%s1080_s1 + $0x80] ss:$8 sps:$4 sm:$0xff]   ;;  %v831_v31 = vld [vmem:[%s1080_s1 + $0x94] ss:$8 sps:$4 sm:$0xff]   ;;  %v833_v32 = vld [vmem:[%s1080_s1 + $0x90] ss:$8 sps:$4 sm:$0xff]   ;;  %s218_s22 = scalar_lea.vmem %s1079_s0, %s769_s11  ;;  %s222_s10 = scalar_lea.vmem %s1084_s5, %s716_s30 }
  0x10   : > { %428 = vmatprep.subr.bf16.mxu0 %v809_v6  ;;  %774 = vmatprep.subr.bf16.mxu1 %v834_v16  ;;  %v850_v29 = vld [vmem:[%s1081_s2 + $0x28] sm:$0xff]   ;;  %v855_v33 = vld [vmem:[%s1081_s2 + $0x30] sm:$0xff]   ;;  %v859_v34 = vld [vmem:[%s1081_s2 + $0x78] sm:$0xff]  }
  0x11   : > { %v836_v35 = vld [vmem:[%s1080_s1 + $0xa4] ss:$8 sps:$4 sm:$0xff]   ;;  %v860_v38 = vld [vmem:[%s1081_s2 + $0x38] sm:$0xff]   ;;  %v838_v41 = vld [vmem:[%s1080_s1 + $0xa0] ss:$8 sps:$4 sm:$0xff]  }
  0x12   : > { %v224_v36 = vld [vmem:[%s218_s22] sm:$0xff]  ;;  %v225_v37 = vld [vmem:[%s218_s22 + $0x8] sm:$0xff]  ;;  %v841_v42 = vld [vmem:[%s1080_s1 + $0xb4] ss:$8 sps:$4 sm:$0xff]  }
  0x13   : > { %429 = vmatpush1.bf16.msra.mxu0 %v811_v7  ;;  %775 = vmatpush3.bf16.msra.mxu1 %v835_v17  ;;  %v226_v39 = vpack.c.bf16 %v224_v36, %v224_v36  ;;  %v227_v40 = vpack.c.bf16 %v225_v37, %v225_v37  ;;  %v843_v45 = vld [vmem:[%s1080_s1 + $0xb0] ss:$8 sps:$4 sm:$0xff]   ;;  %v846_v46 = vld [vmem:[%s1080_s1 + $0xc4] ss:$8 sps:$4 sm:$0xff]   ;;  %v848_v47 = vld [vmem:[%s1080_s1 + $0xc0] ss:$8 sps:$4 sm:$0xff]  }
  0x14   : > { %430 = vmatprep.subr.bf16.mxu0 %v812_v8  ;;  %776 = vmatprep.subr.bf16.mxu1 %v839_v19  ;;  %v851_v48 = vld [vmem:[%s1080_s1 + $0xd4] ss:$8 sps:$4 sm:$0xff]   ;;  %v853_v49 = vld [vmem:[%s1080_s1 + $0xd0] ss:$8 sps:$4 sm:$0xff]   ;;  %v856_v50 = vld [vmem:[%s1080_s1 + $0xe4] ss:$8 sps:$4 sm:$0xff]  }
  0x15   : > { %v229_v43 = vmul.bf16 %v227_v40, %v227_v40  ;;  %454 = vmatprep.mubr.bf16.mxu0 %v227_v40  ;;  %v228_v44 = vmul.bf16 %v226_v39, %v226_v39  ;;  %v858_v51 = vld [vmem:[%s1080_s1 + $0xe0] ss:$8 sps:$4 sm:$0xff]   ;;  %v861_v52 = vld [vmem:[%s1080_s1 + $0xf4] ss:$8 sps:$4 sm:$0xff]   ;;  %v863_v53 = vld [vmem:[%s1080_s1 + $0xf0] ss:$8 sps:$4 sm:$0xff]  }
  0x16   : > { %v765_v4 = vld [vmem:[%s1082_s3] ss:$0 sm:$0xff] }
  0x17   : > { %431 = vmatpush1.bf16.msra.mxu0 %v814_v11  ;;  %777 = vmatpush3.bf16.msra.mxu1 %v840_v20  ;;  %v766_v8 = vld [vmem:[%s1083_s4] ss:$0 sm:$0xff] }
  0x18   : > { %432 = vmatprep.subr.bf16.mxu0 %v815_v14  ;;  %778 = vmatprep.subr.bf16.mxu1 %v844_v23 }
  0x19   : > { %623 = vmatprep.mubr.bf16.mxu1 %v229_v43 }
  0x1b   : > { %433 = vmatpush1.bf16.msra.mxu0 %v817_v15  ;;  %779 = vmatpush3.bf16.msra.mxu1 %v845_v25 }
  0x1c   : > { %434 = vmatprep.subr.bf16.mxu0 %v818_v18  ;;  %780 = vmatprep.subr.bf16.mxu1 %v849_v27 }
  0x1f   : > { %435 = vmatpush1.bf16.msra.mxu0 %v820_v21  ;;  %781 = vmatpush3.bf16.msra.mxu1 %v850_v29 }
  0x20   : > { %436 = vmatprep.subr.bf16.mxu0 %v821_v22  ;;  %782 = vmatprep.subr.bf16.mxu1 %v854_v30 }
  0x23   : > { %437 = vmatpush1.bf16.msra.mxu0 %v823_v24  ;;  %783 = vmatpush3.bf16.msra.mxu1 %v855_v33 }
  0x24   : > { %438 = vmatprep.subr.bf16.mxu0 %v826_v26  ;;  %784 = vmatprep.subr.bf16.mxu1 %v859_v34 }
  0x27   : > { %439 = vmatpush1.bf16.msra.mxu0 %v828_v28  ;;  %785 = vmatpush3.bf16.msra.mxu1 %v860_v38 }
  0x28   : > { %440 = vmatprep.subr.bf16.mxu0 %v831_v31 }
  0x2a   : > { %624 = vmatmul.mubr.bf16.vlgmr.msra.gmra.mrb[0].mxu1 %v228_v44 }
  0x2b   : > { %441 = vmatpush1.bf16.msra.mxu0 %v833_v32 }
  0x2c   : > { %442 = vmatprep.subr.bf16.mxu0 %v836_v35 }
  0x2f   : > { %443 = vmatpush1.bf16.msra.mxu0 %v838_v41 }
  0x30   : > { %444 = vmatprep.subr.bf16.mxu0 %v841_v42 }
  0x33   : > { %445 = vmatpush1.bf16.msra.mxu0 %v843_v45 }
  0x34   : > { %446 = vmatprep.subr.bf16.mxu0 %v846_v46 }
  0x37   : > { %447 = vmatpush1.bf16.msra.mxu0 %v848_v47 }
  0x38   : > { %448 = vmatprep.subr.bf16.mxu0 %v851_v48 }
  0x3b   : > { %449 = vmatpush1.bf16.msra.mxu0 %v853_v49 }
  0x3c   : > { %450 = vmatprep.subr.bf16.mxu0 %v856_v50 }
  0x3f   : > { %451 = vmatpush1.bf16.msra.mxu0 %v858_v51 }
  0x40   : > { %452 = vmatprep.subr.bf16.mxu0 %v861_v52 }
  0x43   : > { %453 = vmatpush1.bf16.msra.mxu0 %v863_v53 }
  0x46   : > { %455 = vmatmul.mubr.bf16.vlgmr.msra.gmra.mrb[0].mxu0 %v226_v39 }
  0xfd   : > { %v786_v54 = vpop.f32.mrb[0].mxu1 }
  0xfe   : > { %v787_v55 = vpop.f32.mrb[1].mxu1 }
  0xff   : > { %v788_v56 = vadd.f32 %v787_v55, %v786_v54  ;;  %v789_v57 = vpop.f32.mrb[2].mxu1 }
 0x100   : > { %v790_v58 = vpop.f32.mrb[3].mxu1 }
 0x119   : > { %v456_v59 = vpop.f32.mrb[0].mxu0 }
 0x11a   : > { %v458_v60 = vpop.f32.mrb[1].mxu0 }
 0x11b   : > { %v631_v61 = vmul.f32 %v458_v60, %v458_v60  ;;  %v460_v62 = vpop.f32.mrb[2].mxu0 }
 0x11c   : > { %v461_v63 = vpop.f32.mrb[3].mxu0 }
 0x11d   : > { %v632_v0 = vsub.f32 %v788_v56, %v631_v61 }
 0x11f   : > { %v633_v1 = vmax.f32 %v632_v0, 0.0 }
 0x121   : > { %v634_v2 = vadd.f32 1e-05, %v633_v1 }
 0x123   : > { %864 = vrsqrt.f32 %v634_v2 }
 0x12d   : > { %v865_v3 = vpop.eup %864 }
 0x12e   : > { %v636_v5 = vmul.f32 %v865_v3, %v456_v59  ;;  %v637_v6 = vmul.f32 %v865_v3, %v458_v60 }
 0x130   : > { %v645_v7 = vmul.f32 %v765_v4, %v637_v6 }
 0x132   : > { %v646_v9 = vsub.f32 %v636_v5, %v645_v7 }
 0x134   : > { %v654_v10 = vadd.f32 %v766_v8, %v646_v9 }
 0x136   : > { %655 = vst [vmem:[%s222_s10] sm:$0xff] %v654_v10 }
 0x137 PF: > { %s15_s18 = sadd.s32 1, %s872_s18  }
 0x138   : > { %p12_p4 = scmp.ge.s32.totalorder %s15_s18, 4  }
 0x13a   :  { %14 = sbr.rel (!%p12_p4) target bundleno = 1 (0x1), region = 70 }

</bundles_post_ra>
